<compile_context>
chip_gen: v7x
topology: tpu7x:2x2x1
jax: 0.10.0
libtpu: 0.0.40
codegen_flags: <defaults>
</compile_context>

<pallas_src>
import math

import jax
import jax.numpy as jnp
from jax.experimental import pallas as pl
from jax.experimental.pallas import tpu as pltpu


def _cdiv(a, b):
    return -(-a // b)


def _make_sigmoid_base_k_kernel(half_ln_k, compute_dtype):
    c = float(half_ln_k)  # Python float -> embedded literal, no captured consts

    def kernel(x_ref, o_ref):
        x = x_ref[...].astype(compute_dtype)
        # sigmoid(x*ln k) == 0.5 + 0.5*tanh(0.5*ln(k)*x): one EUP op/element.
        y = 0.5 + 0.5 * jnp.tanh(x * c)
        o_ref[...] = y.astype(o_ref.dtype)

    return kernel


def _choose_tiling(n_main, dtype, target_tile_bytes):
    """Pick (cols, rows, tile_rows) for a lane-dense 2-D view of n_main elems.

    n_main must be a multiple of 128. tile_rows is a multiple of the dtype's
    native sublane count (or equals rows when rows is smaller than that), and
    the grid uses cdiv, so rows need NOT be divisible by tile_rows.
    """
    itemsize = jnp.dtype(dtype).itemsize
    min_rows = {4: 8, 2: 16, 1: 32}.get(itemsize, 8)

    cols = 128
    for c in (4096, 2048, 1024, 512, 256):
        if n_main % c == 0:
            cols = c
            break
    rows = n_main // cols

    if rows <= min_rows:
        # Tiny array: single block equal to the full extent (always legal).
        return cols, rows, rows

    # Largest sublane-dense tile under the byte target, capped by the array.
    max_rows = max(min_rows,
                   (target_tile_bytes // (cols * itemsize)) // min_rows * min_rows)
    tile_rows = min(max_rows, (rows // min_rows) * min_rows)

    # v7x has 2 TensorCores and shards the "parallel" grid axis across them:
    # make sure there are at least 2 grid steps when the array is big enough.
    if _cdiv(rows, tile_rows) < 2:
        half = _cdiv(_cdiv(rows, 2), min_rows) * min_rows
        tile_rows = max(min_rows, min(tile_rows, half))

    return cols, rows, tile_rows


def sigmoid_base_k(x, k, *, target_tile_bytes=2 * 1024 * 1024):
    """Applies 1/(1 + k^(-x)) elementwise via a Pallas TPU kernel.

    x: array of any shape (NCHW expected, but any shape works). Dtype is
       preserved end-to-end (bf16 in -> bf16 out, f32 in -> f32 out).
    k: python float base (k > 0, static).
    """
    orig_shape = x.shape
    dtype = x.dtype
    n_elem = x.size
    if n_elem == 0:
        return x

    ln_k = math.log(float(k))
    half_ln_k = 0.5 * ln_k
    # bf16 VPU/EUP are native on v6e/v7x; anything else computes in f32
    # (v5e has no bf16 VPU/EUP, and f32 is exact for f32 I/O).
    compute_dtype = jnp.bfloat16 if dtype == jnp.bfloat16 else jnp.float32
    itemsize = jnp.dtype(dtype).itemsize

    x_flat = x.reshape(-1)
    n_tail = n_elem % 128
    n_main = n_elem - n_tail

    outs = []
    if n_main:
        cols, rows, tile_rows = _choose_tiling(n_main, dtype, target_tile_bytes)
        x_main = x_flat if n_tail == 0 else x_flat[:n_main]
        x2d = x_main.reshape(rows, cols)

        kernel = _make_sigmoid_base_k_kernel(half_ln_k, compute_dtype)
        grid = (_cdiv(rows, tile_rows),)

        out2d = pl.pallas_call(
            kernel,
            out_shape=jax.ShapeDtypeStruct((rows, cols), dtype),
            grid_spec=pltpu.PrefetchScalarGridSpec(
                num_scalar_prefetch=0,
                grid=grid,
                in_specs=[pl.BlockSpec((tile_rows, cols), lambda i: (i, 0))],
                out_specs=pl.BlockSpec((tile_rows, cols), lambda i: (i, 0)),
            ),
            compiler_params=pltpu.CompilerParams(
                dimension_semantics=("parallel",),
                # 2 bufs x (in + out) x ~2 MiB tile << 32 MiB; safe on v7x's
                # 64 MiB physical VMEM and above v5e's 16 MiB default scope.
                vmem_limit_bytes=32 * 1024 * 1024,
            ),
            cost_estimate=pl.CostEstimate(
                flops=3 * n_main,
                transcendentals=n_main,
                bytes_accessed=2 * n_main * itemsize,
            ),
        )(x2d)
        outs.append(out2d.reshape(-1))

    if n_tail:
        # <128-element tail: cheaper in plain jnp than padding the whole array.
        xt = x_flat[n_main:].astype(compute_dtype)
        yt = (0.5 + 0.5 * jnp.tanh(xt * half_ln_k)).astype(dtype)
        outs.append(yt)

    out_flat = outs[0] if len(outs) == 1 else jnp.concatenate(outs)
    return out_flat.reshape(orig_shape)


def sigmoid_base_k_ref(x, k):
    # Pure-JAX reference matching torch: 1 / (1 + k**(-x))
    return (1.0 / (1.0 + jnp.power(jnp.float32(k),
                                   -x.astype(jnp.float32)))).astype(x.dtype)


if __name__ == "__main__":
    key = jax.random.PRNGKey(0)
    k = 3.0

    # NCHW input like a VAE activation: batch=2, channels=4, spatial=16x16.
    x = jax.random.normal(key, (2, 4, 16, 16), dtype=jnp.float32)
    out = jax.block_until_ready(sigmoid_base_k(x, k))
    ref = sigmoid_base_k_ref(x, k)
    assert out.shape == x.shape and out.dtype == x.dtype
    assert jnp.allclose(out, ref, atol=1e-5, rtol=1e-5), "mismatch vs reference"

    # Ragged row count (rows=17 -> partial last block on a cdiv grid).
    x2 = jax.random.normal(jax.random.PRNGKey(1), (2, 4, 17, 16), dtype=jnp.float32)
    out2 = jax.block_until_ready(sigmoid_base_k(x2, k))
    ref2 = sigmoid_base_k_ref(x2, k)
    assert out2.shape == x2.shape and out2.dtype == x2.dtype
    assert jnp.allclose(out2, ref2, atol=1e-5, rtol=1e-5), "mismatch vs reference (ragged)"

    print("KERNEL_OK")
</pallas_src>

<mosaic_0001>
module attributes {stable_mosaic.version = 11 : i64} {
  func.func @kernel(%arg0: i32, %arg1: memref<1x2048xf32, #tpu.memory_space<vmem>>, %arg2: memref<1x2048xf32, #tpu.memory_space<vmem>>) attributes {dimension_semantics = [#tpu.dimension_semantics<parallel>], iteration_bounds = array<i64: 1>, scalar_prefetch = 0 : i64, scratch_operands = 0 : i64, tpu.core_type = #tpu.core_type<tc>, window_params = [{transform_indices = @transform_0, window_bounds = array<i64: 1, 2048>}, {transform_indices = @transform_1, window_bounds = array<i64: 1, 2048>}]} {
    %c0 = arith.constant 0 : index
    %c0_0 = arith.constant 0 : index
    %0 = vector.load %arg1[%c0, %c0_0] : memref<1x2048xf32, #tpu.memory_space<vmem>>, vector<1x2048xf32>
    %cst = arith.constant 0.549306154 : f32
    %1 = vector.broadcast %cst : f32 to vector<1x2048xf32>
    %2 = arith.mulf %0, %1 : vector<1x2048xf32>
    %3 = math.tanh %2 : vector<1x2048xf32>
    %cst_1 = arith.constant 5.000000e-01 : f32
    %4 = vector.broadcast %cst_1 : f32 to vector<1x2048xf32>
    %5 = arith.mulf %4, %3 : vector<1x2048xf32>
    %cst_2 = arith.constant 5.000000e-01 : f32
    %6 = vector.broadcast %cst_2 : f32 to vector<1x2048xf32>
    %7 = arith.addf %6, %5 : vector<1x2048xf32>
    %c0_3 = arith.constant 0 : index
    %c0_4 = arith.constant 0 : index
    %8 = vector.load %arg2[%c0_3, %c0_4] : memref<1x2048xf32, #tpu.memory_space<vmem>>, vector<1x2048xf32>
    tpu.vector_store %arg2[%c0_3, %c0_4], %7 {strides = array<i32>} : memref<1x2048xf32, #tpu.memory_space<vmem>>, vector<1x2048xf32>,
    return
  }
  func.func @transform_0(%arg0: i32) -> (i32, i32) {
    %c0_i32 = arith.constant 0 : i32
    %c0_i32_0 = arith.constant 0 : i32
    return %arg0, %c0_i32 : i32, i32
  }
  func.func @transform_1(%arg0: i32) -> (i32, i32) {
    %c0_i32 = arith.constant 0 : i32
    %c0_i32_0 = arith.constant 0 : i32
    return %arg0, %c0_i32 : i32, i32
  }
}

</mosaic_0001>

<bundles_post_ra>
// kernel: tpu_custom_call.1
= control target key start
LH: loop header
LB: loop body
LE: loop exit
PB: predicated region body
PF: predicated region fallthrough
CT: control target
= control target key end

     0   :  { %6 = vsyncpa [#allocation3], 0  ;;  %s138_s0 = inlined_call_operand.hbm [shape: f32[1,2048], index: 0, kind: input, shape index: {}]   ;;  %s139_s1 = inlined_call_operand.hbm [shape: f32[1,2048], index: 1, kind: output, shape index: {}]  }
   0x1   :  { %7 = vsyncpa [#allocation4], 0  ;;  %s102_s6 = smov [#allocation2]   ;;  %s54_s10 = scalar_lea.hbm %s138_s0, 256 }
   0x2   :  { %s14_s7 = sshll.u32 %s102_s6, 4  ;;  %p55_p0 = scmp.ne.s32.totalorder %s138_s0, %s54_s10  ;;  %s15_s7 = int_to_ptr.vmem [resolvable:$true] %s14_s7 }
   0x3   :  { %p58_p1 = scmp.lt.u32.totalorder %s54_s10, %s138_s0 }
   0x5   :  { %p60_p2 = pnand %p58_p1, %p55_p0 }
   0x7   :  { %63 = shalt.err (!%p60_p2)
}
   0x8   :  { %s64_s15 = scalar_lea.vmem %s15_s7, 256  ;;  %p69_p4 = scmp.lt.s32.totalorder %s15_s7, %s15_s7 }
   0x9   :  { %p65_p3 = scmp.ne.s32.totalorder %s15_s7, %s64_s15  ;;  %p70_p5 = scmp.lt.s32.totalorder %s64_s15, %s64_s15 }
   0xb   :  { %p71_p6 = por %p70_p5, %p69_p4 }
   0xd   :  { %p72_p7 = pnand %p71_p6, %p65_p3 }
   0xf   :  { %75 = shalt.err (!%p72_p7)
}
  0x10   :  { %17 = dma.hbm_to_vmem [thread:$0]  %s138_s0, 256, %s15_s7, [#allocation3]  }
  0x11   :  { %98 = dma.done.wait [#allocation3], 256  }
  0x12   :  { %99 = vsyncadd [#allocation3], 4294967040  ;;  %v21_v0 = vld [vmem:[#allocation2] sm:$0xff]  ;;  %v22_v1 = vld [vmem:[#allocation2 + $0x8] sm:$0xff]  ;;  %s103_s18 = smov [#allocation5]  }
  0x13   :  { %v23_v2 = vmul.f32 0.54930615, %v21_v0  ;;  %v24_v3 = vmul.f32 0.54930615, %v22_v1  ;;  %s39_s19 = sshll.u32 %s103_s18, 4  ;;  %s40_s19 = int_to_ptr.vmem [resolvable:$true] %s39_s19 }
  0x14   :  { %s76_s0 = scalar_lea.vmem %s40_s19, 256  ;;  %p81_p9 = scmp.lt.s32.totalorder %s40_s19, %s40_s19 }
  0x15   :  { %50 = vtanh.f32 %v23_v2  ;;  %p77_p8 = scmp.ne.s32.totalorder %s40_s19, %s76_s0  ;;  %p82_p10 = scmp.lt.s32.totalorder %s76_s0, %s76_s0 }
  0x16   :  { %52 = vtanh.f32 %v24_v3 }
  0x17   :  { %p83_p11 = por %p82_p10, %p81_p9 }
  0x19   :  { %p84_p12 = pnand %p83_p11, %p77_p8 }
  0x1f   :  { %v51_v4 = vpop.eup %50 }
  0x20   :  { %v53_v5 = vpop.eup %52  ;;  %v27_v6 = vmul.f32 0.5, %v51_v4 }
  0x21   :  { %v28_v7 = vmul.f32 0.5, %v53_v5 }
  0x22   :  { %v29_v8 = vadd.f32 0.5, %v27_v6 }
  0x23   :  { %v30_v9 = vadd.f32 0.5, %v28_v7 }
  0x24   :  { %31 = vst [vmem:[#allocation5] sm:$0xff] %v29_v8 }
  0x25   :  { %32 = vst [vmem:[#allocation5 + $0x8] sm:$0xff] %v30_v9 }
  0x26   :  { %87 = shalt.err (!%p84_p12)
}
  0x27   :  { %s88_s22 = scalar_lea.hbm %s139_s1, 256 }
  0x28   :  { %p89_p13 = scmp.ne.s32.totalorder %s139_s1, %s88_s22  ;;  %p92_p0 = scmp.lt.u32.totalorder %s88_s22, %s139_s1 }
  0x2a   :  { %p94_p1 = pnand %p92_p0, %p89_p13 }
  0x2c   :  { %97 = shalt.err (!%p94_p1)
}
  0x2d   :  { %42 = dma.vmem_to_hbm [thread:$0]  %s40_s19, 256, %s139_s1, [#allocation4]  }
  0x2e   :  { %100 = dma.done.wait [#allocation4], 256  }
  0x2f   :  { %101 = vsyncadd [#allocation4], 4294967040 }
  0x30   :  { %46 = vsyncpa [#allocation3], 1 }
  0x31   :  { %47 = vsyncpa [#allocation4], 1 }

</bundles_post_ra>
